<compile_context>
chip_gen: v6e
topology: v6e:2x2x1
jax: 0.10.0
libtpu: 0.0.40
codegen_flags: <defaults>
</compile_context>

<pallas_src>
import functools

import numpy as np
import jax
import jax.numpy as jnp
from jax.experimental import pallas as pl
from jax.experimental.pallas import tpu as pltpu  # noqa: F401  (TPU backend)


DEFAULT_EPS = 1e-09


def _rmse_reduce_kernel(pred_ref, true_ref, out_ref, *, scale, eps):
    """Single-tile kernel: out[0,0] = scale * sum(sqrt((p - t)^2 + eps))."""
    p = pred_ref[...].astype(jnp.float32)          # (1, M) lane-dense
    t = true_ref[...].astype(jnp.float32)          # (1, M)
    d = p - t
    loss = jnp.sqrt(d * d + eps)                   # elementwise, VPU/EUP
    out_ref[...] = jnp.reshape(jnp.sum(loss) * scale, (1, 1))


def _rmse_elementwise_kernel(pred_ref, true_ref, out_ref, *, eps):
    """Single-tile kernel for reduction='none': out = sqrt((p - t)^2 + eps)."""
    p = pred_ref[...].astype(jnp.float32)
    t = true_ref[...].astype(jnp.float32)
    d = p - t
    out_ref[...] = jnp.sqrt(d * d + eps)


@functools.partial(jax.jit, static_argnames=("reduction", "eps"))
def rmse_pallas(y_pred, y_true, reduction="mean", eps=DEFAULT_EPS):
    """Pallas implementation of RMSE.forward for reduction in {mean, sum, none}."""
    orig_shape = y_pred.shape
    m = int(np.prod(orig_shape))

    # Lane-dense layout: flatten everything onto the lane (last) axis in the
    # wrapper; block_shape == full array shape so the (8,128) rule is waived.
    p = jnp.reshape(y_pred, (1, m))
    t = jnp.reshape(y_true, (1, m))

    full_spec = pl.BlockSpec((1, m), lambda: (0, 0))

    if reduction == "none":
        out = pl.pallas_call(
            functools.partial(_rmse_elementwise_kernel, eps=float(eps)),
            out_shape=jax.ShapeDtypeStruct((1, m), jnp.float32),
            in_specs=[full_spec, full_spec],
            out_specs=pl.BlockSpec((1, m), lambda: (0, 0)),
        )(p, t)
        return jnp.reshape(out, orig_shape)

    if reduction == "mean":
        scale = 1.0 / float(m)
    elif reduction == "sum":
        scale = 1.0
    else:
        raise ValueError(f"unsupported reduction: {reduction!r}")

    out = pl.pallas_call(
        functools.partial(_rmse_reduce_kernel, scale=scale, eps=float(eps)),
        out_shape=jax.ShapeDtypeStruct((1, 1), jnp.float32),
        in_specs=[full_spec, full_spec],
        out_specs=pl.BlockSpec((1, 1), lambda: (0, 0)),
    )(p, t)
    return out[0, 0]


def rmse_reference(y_pred, y_true, reduction="mean", eps=DEFAULT_EPS):
    """Plain-JAX reference mirroring the PyTorch module."""
    loss = jnp.sqrt((y_pred.astype(jnp.float32) - y_true.astype(jnp.float32)) ** 2 + eps)
    if reduction == "none":
        return loss
    if reduction == "mean":
        return jnp.mean(loss)
    if reduction == "sum":
        return jnp.sum(loss)
    raise ValueError(reduction)


if __name__ == "__main__":
    key = jax.random.PRNGKey(0)
    k1, k2 = jax.random.split(key)

    # feedback-prize style shapes: batch rows x 6 targets.
    N, T = 8, 6
    y_pred = jax.random.normal(k1, (N, T), dtype=jnp.float32)
    y_true = jax.random.normal(k2, (N, T), dtype=jnp.float32)

    ok = True

    # reduction='mean' (the module default)
    out_mean = jax.block_until_ready(rmse_pallas(y_pred, y_true, reduction="mean"))
    ref_mean = jax.block_until_ready(rmse_reference(y_pred, y_true, reduction="mean"))
    ok &= np.allclose(np.asarray(out_mean), np.asarray(ref_mean), rtol=1e-5, atol=1e-5)

    # reduction='sum'
    out_sum = jax.block_until_ready(rmse_pallas(y_pred, y_true, reduction="sum"))
    ref_sum = jax.block_until_ready(rmse_reference(y_pred, y_true, reduction="sum"))
    ok &= np.allclose(np.asarray(out_sum), np.asarray(ref_sum), rtol=1e-5, atol=1e-5)

    # reduction='none'
    out_none = jax.block_until_ready(rmse_pallas(y_pred, y_true, reduction="none"))
    ref_none = jax.block_until_ready(rmse_reference(y_pred, y_true, reduction="none"))
    ok &= np.allclose(np.asarray(out_none), np.asarray(ref_none), rtol=1e-5, atol=1e-5)

    assert ok, (out_mean, ref_mean, out_sum, ref_sum)
    print("KERNEL_OK")
</pallas_src>

<mosaic_0001>
module attributes {stable_mosaic.version = 11 : i64} {
  func.func @_rmse_reduce_kernel(%arg0: memref<1x48xf32, #tpu.memory_space<vmem>>, %arg1: memref<1x48xf32, #tpu.memory_space<vmem>>, %arg2: memref<1x1xf32, #tpu.memory_space<vmem>>) attributes {dimension_semantics = [], scalar_prefetch = 0 : i64, scratch_operands = 0 : i64, tpu.core_type = #tpu.core_type<tc>} {
    %c0 = arith.constant 0 : index
    %c0_0 = arith.constant 0 : index
    %0 = vector.load %arg0[%c0, %c0_0] : memref<1x48xf32, #tpu.memory_space<vmem>>, vector<1x48xf32>
    %c0_1 = arith.constant 0 : index
    %c0_2 = arith.constant 0 : index
    %1 = vector.load %arg1[%c0_1, %c0_2] : memref<1x48xf32, #tpu.memory_space<vmem>>, vector<1x48xf32>
    %2 = arith.subf %0, %1 : vector<1x48xf32>
    %3 = arith.mulf %2, %2 : vector<1x48xf32>
    %cst = arith.constant 9.99999971E-10 : f32
    %4 = vector.broadcast %cst : f32 to vector<1x48xf32>
    %5 = arith.addf %3, %4 : vector<1x48xf32>
    %6 = math.sqrt %5 : vector<1x48xf32>
    %7 = vector.shape_cast %6 : vector<1x48xf32> to vector<1x1x48xf32>
    %cst_3 = arith.constant dense<0.000000e+00> : vector<1xf32>
    %8 = vector.multi_reduction <add>, %7, %cst_3 [1, 2] : vector<1x1x48xf32> to vector<1xf32>
    %9 = vector.shape_cast %8 : vector<1xf32> to vector<1x1x1xf32>
    %10 = vector.extract %9[0, 0, 0] : f32 from vector<1x1x1xf32>
    %cst_4 = arith.constant 0.020833334 : f32
    %11 = arith.mulf %10, %cst_4 : f32
    %12 = vector.broadcast %11 : f32 to vector<1x1xf32>
    %c0_5 = arith.constant 0 : index
    %c0_6 = arith.constant 0 : index
    %13 = vector.load %arg2[%c0_5, %c0_6] : memref<1x1xf32, #tpu.memory_space<vmem>>, vector<1x1xf32>
    tpu.vector_store %arg2[%c0_5, %c0_6], %12 {strides = array<i32>} : memref<1x1xf32, #tpu.memory_space<vmem>>, vector<1x1xf32>,
    return
  }
}

</mosaic_0001>

<bundles_post_ra>
// kernel: rmse_pallas.1
= control target key start
LH: loop header
LB: loop body
LE: loop exit
PB: predicated region body
PF: predicated region fallthrough
CT: control target
= control target key end

     0   :  { %s105_s0 = inlined_call_operand.vmem [shape: f32[1,48], index: 0, kind: input, shape index: {}]   ;;  %s106_s1 = inlined_call_operand.vmem [shape: f32[1,48], index: 1, kind: input, shape index: {}]   ;;  %s107_s2 = inlined_call_operand.hbm [shape: f32[1,1], index: 2, kind: output, shape index: {}]  }
   0x1   :  { %v12_v0 = vld [vmem:[%s105_s0] sm:$0x1] }
   0x2   :  { %v13_v1 = vld [vmem:[%s106_s1] sm:$0x1] }
   0x3   :  { %v14_v2 = vsub.f32 %v12_v0, %v13_v1 }
   0x4   :  { %7 = vsyncpa [#allocation3], 0  ;;  %vm24_vm2 = vcmask 385024   ;;  %s80_s0 = smov [#allocation2]   ;;  %vm37_vm3 = vcmask 0  }
   0x5   :  { %v15_v3 = vmul.f32 %v14_v2, %v14_v2  ;;  %s45_s1 = sshll.u32 %s80_s0, 4  ;;  %s46_s1 = int_to_ptr.vmem [resolvable:$true] %s45_s1 }
   0x6   :  { %s58_s15 = scalar_lea.vmem %s46_s1, 16  ;;  %s62_s16 = scalar_lea.vmem %s46_s1, 32 }
   0x7   :  { %v16_v4 = vadd.f32 1e-09, %v15_v3  ;;  %p59_p0 = scmp.ne.s32.totalorder %s46_s1, %s58_s15  ;;  %p63_p1 = scmp.lt.s32.totalorder %s46_s1, %s46_s1 }
   0x8   :  { %p64_p2 = scmp.lt.s32.totalorder %s62_s16, %s58_s15 }
   0x9   :  { %56 = vrsqrt.f32 %v16_v4  ;;  %vm19_vm0 = vcmp.eq.f32.partialorder %v16_v4, inf  ;;  %v22_v6 = vand.u32 2147483648, %v16_v4  ;;  %vm21_vm1 = vcmp.eq.f32.partialorder %v16_v4, 0.0 }
   0xa   :  { %p65_p3 = por %p64_p2, %p63_p1 }
   0xc   :  { %p66_p4 = pnand %p65_p3, %p59_p0 }
  0x16   :  { %v57_v5 = vpop.eup %56 }
  0x17   :  { %v18_v7 = vmul.f32 %v57_v5, %v16_v4 }
  0x19   :  { %v20_v8 = vsel %vm19_vm0, %v16_v4, %v18_v7 }
  0x1a   :  { %v23_v9 = vsel %vm21_vm1, %v22_v6, %v20_v8 }
  0x1b   :  { %v25_v10 = vsel %vm24_vm2, %v23_v9, 0.0 }
  0x1c   :  { %26 = vadd.xlane.f32.xlu0 %v25_v10 }
  0xa5   :  { %v27_v11 = vpop.xlane.xlu0 %26 }
  0xa6   :  { %v28_v12 = vrot.slane %v27_v11, 4 }
  0xa8   :  { %v29_v13 = vadd.f32 %v28_v12, %v27_v11 }
  0xaa   :  { %v30_v14 = vrot.slane %v29_v13, 2 }
  0xac   :  { %v31_v15 = vadd.f32 %v30_v14, %v29_v13 }
  0xae   :  { %v32_v16 = vrot.slane %v31_v15, 1 }
  0xb0   :  { %v33_v17 = vadd.f32 %v32_v16, %v31_v15 }
  0xb2   :  { %53 = vpush %v33_v17 }
  0xe3   :  { %s54_s13 = spop %53 }
  0xe4   :  { %s35_s14 = smul.f32 0.020833334, %s54_s13 }
  0xe6   :  { %v36_v18 = vstv %s35_s14 }
  0xe7   :  { %38 = vst.msk [vmem:[#allocation2] sm:$0x1] %vm37_vm3, %v36_v18 }
  0xe8   :  { %69 = shalt.err (!%p66_p4)
}
  0xe9   :  { %48 = dma.vmem_to_hbm [thread:$0]  %s46_s1, 16, %s107_s2, [#allocation3]  }
  0xea   :  { %78 = dma.done.wait [#allocation3], 16  }
  0xeb   :  { %79 = vsyncadd [#allocation3], 4294967280 }
  0xec   :  { %52 = vsyncpa [#allocation3], 1 }

</bundles_post_ra>
